<compile_context>
chip_gen: v7x
topology: tpu7x:2x2x1
jax: 0.10.0
libtpu: 0.0.40
codegen_flags: <defaults>
</compile_context>

<pallas_src>
import jax
import jax.numpy as jnp
from jax.experimental import pallas as pl
from jax.experimental.pallas import tpu as pltpu

# ----------------------------- config ---------------------------------------
B = 2            # batch
L = 8            # sequence length
N = B * L        # flattened tokens
V = 64           # vocab size (synthetic)
H = 32           # bert hidden size
F = 4 * H        # bert FFN intermediate (128)
E = 16           # opt.embed_size  (!= H  -> fc is a Linear)
PAD = 128        # lane-tile width used to align fused-GEMM column chunks
LN_EPS = 1e-12

W_ROWS, W_COLS = 384, 3 * PAD     # bf16 weight slab
B_ROWS = 16                       # f32 bias / LayerNorm slab rows


# ----------------------------- kernel ---------------------------------------
def encoder_kernel(emb_ref, abias_ref, w_ref, b_ref, out_ref):
    x = emb_ref[...]             # (N, H) f32 summed word+pos+type embeddings
    bp = b_ref[...]              # (B_ROWS, 3*PAD) f32 bias / LN slab
    ab = abias_ref[...]          # (3N, 2N) f32 attention-bias slab

    bf16 = jnp.bfloat16

    def layernorm(v, g, b):
        mu = jnp.mean(v, axis=-1, keepdims=True)
        var = jnp.mean((v - mu) ** 2, axis=-1, keepdims=True)
        return (v - mu) * jax.lax.rsqrt(var + LN_EPS) * g + b

    def softmax(s):
        m = jnp.max(s, axis=-1, keepdims=True)
        e = jnp.exp(s - m)
        return e * pl.reciprocal(jnp.sum(e, axis=-1, keepdims=True), approx=True)

    def mm(a_bf, w_bf):          # bf16 x bf16 -> f32 accumulate on the MXU
        return jnp.dot(a_bf, w_bf, preferred_element_type=jnp.float32)

    def mm_nt(a_bf, b_bf):       # a @ b.T without materializing a transpose
        return jax.lax.dot_general(a_bf, b_bf, (((1,), (1,)), ((), ())),
                                   preferred_element_type=jnp.float32)

    # ---- carve weights (already bf16) out of the slab; static tile-aligned ---
    qkv_w    = w_ref[0:32, :]            # (H, 3*PAD): q|k|v chunks, q pre-scaled
    ca_qkv_w = w_ref[32:48, :]           # (E, 3*PAD): q|k|v in-proj chunks
    mt_w1    = w_ref[48:80, 0:2 * PAD]   # (H, 2*PAD): fc-folded mod|task L1
    ffn_w1   = w_ref[80:112, 0:F]
    ffn_w2   = w_ref[112:240, 0:H]
    ao_w     = w_ref[240:272, 0:H]
    fc_w     = w_ref[272:304, 0:E]
    mod_w2   = w_ref[304:336, 0:E]
    task_w2  = w_ref[336:384, 0:E]

    ln0_g, ln0_b = bp[0:1, 0:H], bp[1:2, 0:H]
    ln1_g, ln1_b = bp[2:3, 0:H], bp[3:4, 0:H]
    ln2_g, ln2_b = bp[4:5, 0:H], bp[5:6, 0:H]
    qkv_b    = bp[6:7, :]
    ao_b     = bp[7:8, 0:H]
    ffn_b1   = bp[8:9, 0:F]
    ffn_b2   = bp[9:10, 0:H]
    fc_b     = bp[10:11, 0:E]
    mt_b1    = bp[11:12, 0:2 * PAD]
    mod_b2   = bp[12:13, 0:E]
    task_b2  = bp[13:14, 0:E]
    ca_qkv_b = bp[14:15, :]

    bert_bias = ab[0:N, 0:N]             # padding (-1e4) + cross-batch (-1e9)
    ca_bias   = ab[N:3 * N, 0:2 * N]     # other-half & same-batch valid, else -1e9

    # ---------------- synthetic single-layer, single-head BERT ----------------
    h = layernorm(x, ln0_g, ln0_b)                               # (N, H) f32
    qkv = (mm(h.astype(bf16), qkv_w) + qkv_b).astype(bf16)       # (N, 3*PAD)
    q, k, v = qkv[:, 0:PAD], qkv[:, PAD:2 * PAD], qkv[:, 2 * PAD:]

    # 1/sqrt(H) already folded into the q weight/bias columns.
    scores = mm_nt(q, k) + bert_bias                             # (N, N) f32
    attn = softmax(scores).astype(bf16)
    ctx = mm(attn, v)                                            # (N, PAD); cols>=H are 0
    attn_out = mm(ctx[:, 0:H].astype(bf16), ao_w) + ao_b         # (N, H)

    h1 = layernorm(h + attn_out, ln1_g, ln1_b)
    h1_bf = h1.astype(bf16)
    # TODO(synk): PyTorch BertModel uses exact erf-GELU; tanh approximation kept
    # (synthetic backbone, maps directly to the EUP).
    ff = jax.nn.gelu(mm(h1_bf, ffn_w1) + ffn_b1)                 # (N, F)
    ff = mm(ff.astype(bf16), ffn_w2) + ffn_b2                    # (N, H)
    bert_emb = layernorm(h1 + ff, ln2_g, ln2_b)                  # (N, H)
    be_bf = bert_emb.astype(bf16)

    # ---------------- fc (H -> E) + CrossAttention (eval mode) ----------------
    cap = mm(be_bf, fc_w) + fc_b                                 # (N, E) residual branch
    mt = mm(be_bf, mt_w1) + mt_b1                                # (N, 2*PAD): fc folded in

    u = jax.nn.sigmoid(
        mm(jax.nn.relu(mt[:, 0:2 * E]).astype(bf16), mod_w2) + mod_b2)           # (N, E)
    r = jax.nn.sigmoid(
        mm(jax.nn.relu(mt[:, PAD:PAD + 3 * E]).astype(bf16), task_w2) + task_b2)  # (N, E)

    ur = jnp.concatenate([u, r], axis=0).astype(bf16)            # (2N, E): rows [u; r]
    proj = (mm(ur, ca_qkv_w) + ca_qkv_b).astype(bf16)            # (2N, 3*PAD)
    Q = proj[:, 0:PAD]            # rows [uq; rq]
    K = proj[:, PAD:2 * PAD]      # rows [uk; rk]
    V_ = proj[:, 2 * PAD:]        # rows [uv; rv]

    # Fused cross-attention: one (2N,2N) score GEMM.  The bias only allows a row
    # to attend to the *other* half within the same batch, so rows 0:N reproduce
    # softmax(uq@rk^T)@rv and rows N:2N reproduce softmax(rq@uk^T)@uv.
    # (No 1/sqrt(E) scale: the reference CrossAttention applies none.)
    s2 = mm_nt(Q, K) + ca_bias                                   # (2N, 2N) f32
    a2 = softmax(s2).astype(bf16)
    ctx2 = mm(a2, V_)                                            # (2N, PAD); cols>=E are 0

    # 0.6 * ((ru + ur) / 2) + cap
    res = 0.3 * (ctx2[0:N, 0:E] + ctx2[N:2 * N, 0:E]) + cap
    out_ref[...] = res.astype(out_ref.dtype)


# ----------------------------- wrapper ---------------------------------------
def encoder_text_bert_forward(x_ids, lengths, params):
    """x_ids: int32 (B, L) token ids; lengths unused (matches PyTorch forward)."""
    del lengths  # unused in the reference forward as well

    # --- glue (plain JAX): embedding gather + precomputed attention biases ---
    mask = (x_ids != 0).astype(jnp.float32)                      # (B, L)
    emb = (params["word_emb"][x_ids]
           + params["pos_emb"][None, :, :]
           + params["type_emb"][0][None, None, :]).astype(jnp.float32)
    emb = emb.reshape(N, H)

    batch_of = jnp.arange(N, dtype=jnp.int32) // L
    same_b = batch_of[:, None] == batch_of[None, :]
    key_valid = mask.reshape(N)
    # BERT self-attn bias: padding (mask-1)*1e4 within batch, -1e9 cross-batch.
    bert_bias = jnp.where(same_b, (key_valid[None, :] - 1.0) * 1e4, -1e9)

    # Fused cross-attention bias over stacked [u; r]: valid iff other half AND
    # same batch (no padding mask — the reference CrossAttention applies none).
    half = jnp.arange(2 * N, dtype=jnp.int32) // N
    b2 = jnp.tile(batch_of, 2)
    valid = (half[:, None] != half[None, :]) & (b2[:, None] == b2[None, :])
    ca_bias = jnp.where(valid, 0.0, -1e9).astype(jnp.float32)

    abias = jnp.zeros((3 * N, 2 * N), jnp.float32)
    abias = abias.at[0:N, 0:N].set(bert_bias)
    abias = abias.at[N:3 * N, :].set(ca_bias)

    w_slab = params["w_slab"]   # (384, 384) bf16
    b_slab = params["b_slab"]   # (16, 384) f32

    def full_spec(a):
        return pl.BlockSpec(a.shape, lambda i: (0, 0))

    out = pl.pallas_call(
        encoder_kernel,
        out_shape=jax.ShapeDtypeStruct((N, E), jnp.float32),
        grid_spec=pltpu.PrefetchScalarGridSpec(
            num_scalar_prefetch=0,
            grid=(1,),                                    # collapsed batch grid
            in_specs=[full_spec(emb), full_spec(abias),
                      full_spec(w_slab), full_spec(b_slab)],
            out_specs=pl.BlockSpec((N, E), lambda i: (0, 0)),
        ),
        compiler_params=pltpu.CompilerParams(
            dimension_semantics=("arbitrary",)),
    )(emb, abias, w_slab, b_slab)

    return out.reshape(B, L, E)


# ----------------------------- param init ------------------------------------
def make_params(key):
    ks = iter(jax.random.split(key, 32))

    def rnd(shape, scale=0.02):
        return scale * jax.random.normal(next(ks), shape, dtype=jnp.float32)

    # f32 master weights (biases zero, as in the synthetic init)
    word_emb = rnd((V, H)); pos_emb = rnd((L, H)); type_emb = rnd((2, H))
    qkv_w = rnd((H, 3 * H));  qkv_b = jnp.zeros((3 * H,), jnp.float32)
    ao_w = rnd((H, H));       ao_b = jnp.zeros((H,), jnp.float32)
    ffn_w1 = rnd((H, F));     ffn_b1 = jnp.zeros((F,), jnp.float32)
    ffn_w2 = rnd((F, H));     ffn_b2 = jnp.zeros((H,), jnp.float32)
    fc_w = rnd((H, E));       fc_b = jnp.zeros((E,), jnp.float32)
    mod_w1 = rnd((E, 2 * E)); mod_b1 = jnp.zeros((2 * E,), jnp.float32)
    mod_w2 = rnd((2 * E, E)); mod_b2 = jnp.zeros((E,), jnp.float32)
    task_w1 = rnd((E, 3 * E)); task_b1 = jnp.zeros((3 * E,), jnp.float32)
    task_w2 = rnd((3 * E, E)); task_b2 = jnp.zeros((E,), jnp.float32)
    q_in_w = rnd((E, E)); q_in_b = jnp.zeros((E,), jnp.float32)
    k_in_w = rnd((E, E)); k_in_b = jnp.zeros((E,), jnp.float32)
    v_in_w = rnd((E, E)); v_in_b = jnp.zeros((E,), jnp.float32)

    # --- constant folds (parameter-build time, not per call) ---
    inv_sqrt_h = 1.0 / (H ** 0.5)
    wq = qkv_w[:, :H] * inv_sqrt_h            # fold attention scale into q
    bq = qkv_b[:H] * inv_sqrt_h
    mod_w1f = fc_w @ mod_w1;  mod_b1f = fc_b @ mod_w1 + mod_b1    # fold fc into L1s
    task_w1f = fc_w @ task_w1; task_b1f = fc_b @ task_w1 + task_b1

    # --- bf16 weight slab; fused chunks start on 128-lane tile boundaries ---
    wsl = jnp.zeros((W_ROWS, W_COLS), jnp.float32)
    wsl = wsl.at[0:32, 0:H].set(wq)
    wsl = wsl.at[0:32, PAD:PAD + H].set(qkv_w[:, H:2 * H])
    wsl = wsl.at[0:32, 2 * PAD:2 * PAD + H].set(qkv_w[:, 2 * H:])
    wsl = wsl.at[32:48, 0:E].set(q_in_w)
    wsl = wsl.at[32:48, PAD:PAD + E].set(k_in_w)
    wsl = wsl.at[32:48, 2 * PAD:2 * PAD + E].set(v_in_w)
    wsl = wsl.at[48:80, 0:2 * E].set(mod_w1f)
    wsl = wsl.at[48:80, PAD:PAD + 3 * E].set(task_w1f)
    wsl = wsl.at[80:112, 0:F].set(ffn_w1)
    wsl = wsl.at[112:240, 0:H].set(ffn_w2)
    wsl = wsl.at[240:272, 0:H].set(ao_w)
    wsl = wsl.at[272:304, 0:E].set(fc_w)
    wsl = wsl.at[304:336, 0:E].set(mod_w2)
    wsl = wsl.at[336:384, 0:E].set(task_w2)
    w_slab = wsl.astype(jnp.bfloat16)

    # --- f32 bias / LayerNorm slab ---
    bsl = jnp.zeros((B_ROWS, W_COLS), jnp.float32)
    bsl = bsl.at[0, 0:H].set(1.0)   # ln0 gamma (betas rows 1,3,5 stay zero)
    bsl = bsl.at[2, 0:H].set(1.0)   # ln1 gamma
    bsl = bsl.at[4, 0:H].set(1.0)   # ln2 gamma
    bsl = bsl.at[6, 0:H].set(bq)
    bsl = bsl.at[6, PAD:PAD + H].set(qkv_b[H:2 * H])
    bsl = bsl.at[6, 2 * PAD:2 * PAD + H].set(qkv_b[2 * H:])
    bsl = bsl.at[7, 0:H].set(ao_b)
    bsl = bsl.at[8, 0:F].set(ffn_b1)
    bsl = bsl.at[9, 0:H].set(ffn_b2)
    bsl = bsl.at[10, 0:E].set(fc_b)
    bsl = bsl.at[11, 0:2 * E].set(mod_b1f)
    bsl = bsl.at[11, PAD:PAD + 3 * E].set(task_b1f)
    bsl = bsl.at[12, 0:E].set(mod_b2)
    bsl = bsl.at[13, 0:E].set(task_b2)
    bsl = bsl.at[14, 0:E].set(q_in_b)
    bsl = bsl.at[14, PAD:PAD + E].set(k_in_b)
    bsl = bsl.at[14, 2 * PAD:2 * PAD + E].set(v_in_b)

    return dict(word_emb=word_emb, pos_emb=pos_emb, type_emb=type_emb,
                w_slab=w_slab, b_slab=bsl)


# ----------------------------- main -------------------------------------------
if __name__ == "__main__":
    key = jax.random.PRNGKey(0)
    k_ids, k_params = jax.random.split(key)

    # Token ids with trailing padding zeros (exercises the attention mask).
    x = jax.random.randint(k_ids, (B, L), 1, V, dtype=jnp.int32)
    x = x.at[:, 6:].set(0)
    lengths = jnp.array([6, 6], dtype=jnp.int32)

    params = make_params(k_params)

    out = encoder_text_bert_forward(x, lengths, params)
    out = jax.block_until_ready(out)

    assert out.shape == (B, L, E) and out.dtype == jnp.float32
    assert bool(jnp.all(jnp.isfinite(out)))
    print("KERNEL_OK")
</pallas_src>

<mosaic_0001>
module attributes {stable_mosaic.version = 11 : i64} {
  func.func @encoder_kernel(%arg0: i32, %arg1: memref<16x32xf32, #tpu.memory_space<vmem>>, %arg2: memref<48x32xf32, #tpu.memory_space<vmem>>, %arg3: memref<384x384xbf16, #tpu.memory_space<vmem>>, %arg4: memref<16x384xf32, #tpu.memory_space<vmem>>, %arg5: memref<16x16xf32, #tpu.memory_space<vmem>>) attributes {dimension_semantics = [#tpu.dimension_semantics<arbitrary>], iteration_bounds = array<i64: 1>, scalar_prefetch = 0 : i64, scratch_operands = 0 : i64, tpu.core_type = #tpu.core_type<tc>, window_params = [{pipeline_mode = #tpu.pipeline_mode<synchronous>, transform_indices = @transform_0, window_bounds = array<i64: 16, 32>}, {pipeline_mode = #tpu.pipeline_mode<synchronous>, transform_indices = @transform_1, window_bounds = array<i64: 48, 32>}, {pipeline_mode = #tpu.pipeline_mode<synchronous>, transform_indices = @transform_2, window_bounds = array<i64: 384, 384>}, {pipeline_mode = #tpu.pipeline_mode<synchronous>, transform_indices = @transform_3, window_bounds = array<i64: 16, 384>}, {pipeline_mode = #tpu.pipeline_mode<synchronous>, transform_indices = @transform_4, window_bounds = array<i64: 16, 16>}]} {
    %c0 = arith.constant 0 : index
    %c0_0 = arith.constant 0 : index
    %0 = vector.load %arg1[%c0, %c0_0] : memref<16x32xf32, #tpu.memory_space<vmem>>, vector<16x32xf32>
    %c0_1 = arith.constant 0 : index
    %c0_2 = arith.constant 0 : index
    %1 = vector.load %arg4[%c0_1, %c0_2] : memref<16x384xf32, #tpu.memory_space<vmem>>, vector<16x384xf32>
    %c0_3 = arith.constant 0 : index
    %c0_4 = arith.constant 0 : index
    %2 = vector.load %arg2[%c0_3, %c0_4] : memref<48x32xf32, #tpu.memory_space<vmem>>, vector<48x32xf32>
    %c0_5 = arith.constant 0 : index
    %c0_6 = arith.constant 0 : index
    %3 = vector.load %arg3[%c0_5, %c0_6] : memref<384x384xbf16, #tpu.memory_space<vmem>>, vector<32x384xbf16>
    %c32 = arith.constant 32 : index
    %c0_7 = arith.constant 0 : index
    %4 = vector.load %arg3[%c32, %c0_7] : memref<384x384xbf16, #tpu.memory_space<vmem>>, vector<16x384xbf16>
    %c48 = arith.constant 48 : index
    %c0_8 = arith.constant 0 : index
    %5 = vector.load %arg3[%c48, %c0_8] : memref<384x384xbf16, #tpu.memory_space<vmem>>, vector<32x256xbf16>
    %c80 = arith.constant 80 : index
    %c0_9 = arith.constant 0 : index
    %6 = vector.load %arg3[%c80, %c0_9] : memref<384x384xbf16, #tpu.memory_space<vmem>>, vector<32x128xbf16>
    %c112 = arith.constant 112 : index
    %c0_10 = arith.constant 0 : index
    %7 = vector.load %arg3[%c112, %c0_10] : memref<384x384xbf16, #tpu.memory_space<vmem>>, vector<128x32xbf16>
    %c240 = arith.constant 240 : index
    %c0_11 = arith.constant 0 : index
    %8 = vector.load %arg3[%c240, %c0_11] : memref<384x384xbf16, #tpu.memory_space<vmem>>, vector<32x32xbf16>
    %c272 = arith.constant 272 : index
    %c0_12 = arith.constant 0 : index
    %9 = vector.load %arg3[%c272, %c0_12] : memref<384x384xbf16, #tpu.memory_space<vmem>>, vector<32x16xbf16>
    %c304 = arith.constant 304 : index
    %c0_13 = arith.constant 0 : index
    %10 = vector.load %arg3[%c304, %c0_13] : memref<384x384xbf16, #tpu.memory_space<vmem>>, vector<32x16xbf16>
    %c336 = arith.constant 336 : index
    %c0_14 = arith.constant 0 : index
    %11 = vector.load %arg3[%c336, %c0_14] : memref<384x384xbf16, #tpu.memory_space<vmem>>, vector<48x16xbf16>
    %12 = vector.extract_strided_slice %1 {offsets = [0, 0], sizes = [1, 32], strides = [1, 1]} : vector<16x384xf32> to vector<1x32xf32>
    %13 = vector.extract_strided_slice %1 {offsets = [1, 0], sizes = [1, 32], strides = [1, 1]} : vector<16x384xf32> to vector<1x32xf32>
    %14 = vector.extract_strided_slice %1 {offsets = [2, 0], sizes = [1, 32], strides = [1, 1]} : vector<16x384xf32> to vector<1x32xf32>
    %15 = vector.extract_strided_slice %1 {offsets = [3, 0], sizes = [1, 32], strides = [1, 1]} : vector<16x384xf32> to vector<1x32xf32>
    %16 = vector.extract_strided_slice %1 {offsets = [4, 0], sizes = [1, 32], strides = [1, 1]} : vector<16x384xf32> to vector<1x32xf32>
    %17 = vector.extract_strided_slice %1 {offsets = [5, 0], sizes = [1, 32], strides = [1, 1]} : vector<16x384xf32> to vector<1x32xf32>
    %18 = vector.extract_strided_slice %1 {offsets = [6, 0], sizes = [1, 384], strides = [1, 1]} : vector<16x384xf32> to vector<1x384xf32>
    %19 = vector.extract_strided_slice %1 {offsets = [7, 0], sizes = [1, 32], strides = [1, 1]} : vector<16x384xf32> to vector<1x32xf32>
    %20 = vector.extract_strided_slice %1 {offsets = [8, 0], sizes = [1, 128], strides = [1, 1]} : vector<16x384xf32> to vector<1x128xf32>
    %21 = vector.extract_strided_slice %1 {offsets = [9, 0], sizes = [1, 32], strides = [1, 1]} : vector<16x384xf32> to vector<1x32xf32>
    %22 = vector.extract_strided_slice %1 {offsets = [10, 0], sizes = [1, 16], strides = [1, 1]} : vector<16x384xf32> to vector<1x16xf32>
    %23 = vector.extract_strided_slice %1 {offsets = [11, 0], sizes = [1, 256], strides = [1, 1]} : vector<16x384xf32> to vector<1x256xf32>
    %24 = vector.extract_strided_slice %1 {offsets = [12, 0], sizes = [1, 16], strides = [1, 1]} : vector<16x384xf32> to vector<1x16xf32>
    %25 = vector.extract_strided_slice %1 {offsets = [13, 0], sizes = [1, 16], strides = [1, 1]} : vector<16x384xf32> to vector<1x16xf32>
    %26 = vector.extract_strided_slice %1 {offsets = [14, 0], sizes = [1, 384], strides = [1, 1]} : vector<16x384xf32> to vector<1x384xf32>
    %27 = vector.extract_strided_slice %2 {offsets = [0, 0], sizes = [16, 16], strides = [1, 1]} : vector<48x32xf32> to vector<16x16xf32>
    %28 = vector.extract_strided_slice %2 {offsets = [16, 0], sizes = [32, 32], strides = [1, 1]} : vector<48x32xf32> to vector<32x32xf32>
    %cst = arith.constant dense<0.000000e+00> : vector<16xf32>
    %29 = vector.multi_reduction <add>, %0, %cst [1] : vector<16x32xf32> to vector<16xf32>
    %30 = vector.shape_cast %29 : vector<16xf32> to vector<16x1xf32>
    %cst_15 = arith.constant 3.200000e+01 : f32
    %31 = vector.broadcast %cst_15 : f32 to vector<16x1xf32>
    %32 = arith.divf %30, %31 : vector<16x1xf32>
    %33 = vector.broadcast %32 : vector<16x1xf32> to vector<16x32xf32>
    %34 = arith.subf %0, %33 : vector<16x32xf32>
    %35 = arith.mulf %34, %34 : vector<16x32xf32>
    %cst_16 = arith.constant dense<0.000000e+00> : vector<16xf32>
    %36 = vector.multi_reduction <add>, %35, %cst_16 [1] : vector<16x32xf32> to vector<16xf32>
    %37 = vector.shape_cast %36 : vector<16xf32> to vector<16x1xf32>
    %cst_17 = arith.constant 3.200000e+01 : f32
    %38 = vector.broadcast %cst_17 : f32 to vector<16x1xf32>
    %39 = arith.divf %37, %38 : vector<16x1xf32>
    %40 = vector.broadcast %32 : vector<16x1xf32> to vector<16x32xf32>
    %41 = arith.subf %0, %40 : vector<16x32xf32>
    %cst_18 = arith.constant 9.99999996E-13 : f32
    %42 = vector.broadcast %cst_18 : f32 to vector<16x1xf32>
    %43 = arith.addf %39, %42 : vector<16x1xf32>
    %44 = math.rsqrt %43 : vector<16x1xf32>
    %45 = vector.broadcast %44 : vector<16x1xf32> to vector<16x32xf32>
    %46 = arith.mulf %41, %45 : vector<16x32xf32>
    %47 = vector.broadcast %12 : vector<1x32xf32> to vector<16x32xf32>
    %48 = arith.mulf %46, %47 : vector<16x32xf32>
    %49 = vector.broadcast %13 : vector<1x32xf32> to vector<16x32xf32>
    %50 = arith.addf %48, %49 : vector<16x32xf32>
    %51 = arith.truncf %50 : vector<16x32xf32> to vector<16x32xbf16>
    %cst_19 = arith.constant dense<0.000000e+00> : vector<16x384xf32>
    %52 = tpu.matmul %51, %3, %cst_19 {dimension_numbers = #tpu.dot_dimension_numbers<[1], [0], [0], [1], [0, 0, 1, 1], [], []>} : vector<16x32xbf16>, vector<32x384xbf16>, vector<16x384xf32> -> vector<16x384xf32>
    %53 = vector.broadcast %18 : vector<1x384xf32> to vector<16x384xf32>
    %54 = arith.addf %52, %53 : vector<16x384xf32>
    %55 = arith.truncf %54 : vector<16x384xf32> to vector<16x384xbf16>
    %56 = vector.extract_strided_slice %55 {offsets = [0, 0], sizes = [16, 128], strides = [1, 1]} : vector<16x384xbf16> to vector<16x128xbf16>
    %57 = vector.extract_strided_slice %55 {offsets = [0, 128], sizes = [16, 128], strides = [1, 1]} : vector<16x384xbf16> to vector<16x128xbf16>
    %58 = vector.extract_strided_slice %55 {offsets = [0, 256], sizes = [16, 128], strides = [1, 1]} : vector<16x384xbf16> to vector<16x128xbf16>
    %cst_20 = arith.constant dense<0.000000e+00> : vector<16x16xf32>
    %59 = tpu.matmul %56, %57, %cst_20 {dimension_numbers = #tpu.dot_dimension_numbers<[1], [1], [0], [0], [0, 0, 1, 0], [], []>} : vector<16x128xbf16>, vector<16x128xbf16>, vector<16x16xf32> -> vector<16x16xf32>
    %60 = arith.addf %59, %27 : vector<16x16xf32>
    %cst_21 = arith.constant dense<0xFF800000> : vector<16xf32>
    %61 = vector.multi_reduction <maximumf>, %60, %cst_21 [1] : vector<16x16xf32> to vector<16xf32>
    %62 = vector.shape_cast %61 : vector<16xf32> to vector<16x1xf32>
    %63 = vector.broadcast %62 : vector<16x1xf32> to vector<16x16xf32>
    %64 = arith.subf %60, %63 : vector<16x16xf32>
    %65 = math.exp %64 : vector<16x16xf32>
    %cst_22 = arith.constant dense<0.000000e+00> : vector<16xf32>
    %66 = vector.multi_reduction <add>, %65, %cst_22 [1] : vector<16x16xf32> to vector<16xf32>
    %67 = vector.shape_cast %66 : vector<16xf32> to vector<16x1xf32>
    %68 = tpu.reciprocal %67 {approx = true} : vector<16x1xf32> -> vector<16x1xf32>
    %69 = vector.broadcast %68 : vector<16x1xf32> to vector<16x16xf32>
    %70 = arith.mulf %65, %69 : vector<16x16xf32>
    %71 = arith.truncf %70 : vector<16x16xf32> to vector<16x16xbf16>
    %cst_23 = arith.constant dense<0.000000e+00> : vector<16x128xf32>
    %72 = tpu.matmul %71, %58, %cst_23 {dimension_numbers = #tpu.dot_dimension_numbers<[1], [0], [0], [1], [0, 0, 1, 1], [], []>} : vector<16x16xbf16>, vector<16x128xbf16>, vector<16x128xf32> -> vector<16x128xf32>
    %73 = vector.extract_strided_slice %72 {offsets = [0, 0], sizes = [16, 32], strides = [1, 1]} : vector<16x128xf32> to vector<16x32xf32>
    %74 = arith.truncf %73 : vector<16x32xf32> to vector<16x32xbf16>
    %cst_24 = arith.constant dense<0.000000e+00> : vector<16x32xf32>
    %75 = tpu.matmul %74, %8, %cst_24 {dimension_numbers = #tpu.dot_dimension_numbers<[1], [0], [0], [1], [0, 0, 1, 1], [], []>} : vector<16x32xbf16>, vector<32x32xbf16>, vector<16x32xf32> -> vector<16x32xf32>
    %76 = vector.broadcast %19 : vector<1x32xf32> to vector<16x32xf32>
    %77 = arith.addf %75, %76 : vector<16x32xf32>
    %78 = arith.addf %50, %77 : vector<16x32xf32>
    %cst_25 = arith.constant dense<0.000000e+00> : vector<16xf32>
    %79 = vector.multi_reduction <add>, %78, %cst_25 [1] : vector<16x32xf32> to vector<16xf32>
    %80 = vector.shape_cast %79 : vector<16xf32> to vector<16x1xf32>
    %cst_26 = arith.constant 3.200000e+01 : f32
    %81 = vector.broadcast %cst_26 : f32 to vector<16x1xf32>
    %82 = arith.divf %80, %81 : vector<16x1xf32>
    %83 = vector.broadcast %82 : vector<16x1xf32> to vector<16x32xf32>
    %84 = arith.subf %78, %83 : vector<16x32xf32>
    %85 = arith.mulf %84, %84 : vector<16x32xf32>
    %cst_27 = arith.constant dense<0.000000e+00> : vector<16xf32>
    %86 = vector.multi_reduction <add>, %85, %cst_27 [1] : vector<16x32xf32> to vector<16xf32>
    %87 = vector.shape_cast %86 : vector<16xf32> to vector<16x1xf32>
    %cst_28 = arith.constant 3.200000e+01 : f32
    %88 = vector.broadcast %cst_28 : f32 to vector<16x1xf32>
    %89 = arith.divf %87, %88 : vector<16x1xf32>
    %90 = vector.broadcast %82 : vector<16x1xf32> to vector<16x32xf32>
    %91 = arith.subf %78, %90 : vector<16x32xf32>
    %cst_29 = arith.constant 9.99999996E-13 : f32
    %92 = vector.broadcast %cst_29 : f32 to vector<16x1xf32>
    %93 = arith.addf %89, %92 : vector<16x1xf32>
    %94 = math.rsqrt %93 : vector<16x1xf32>
    %95 = vector.broadcast %94 : vector<16x1xf32> to vector<16x32xf32>
    %96 = arith.mulf %91, %95 : vector<16x32xf32>
    %97 = vector.broadcast %14 : vector<1x32xf32> to vector<16x32xf32>
    %98 = arith.mulf %96, %97 : vector<16x32xf32>
    %99 = vector.broadcast %15 : vector<1x32xf32> to vector<16x32xf32>
    %100 = arith.addf %98, %99 : vector<16x32xf32>
    %101 = arith.truncf %100 : vector<16x32xf32> to vector<16x32xbf16>
    %cst_30 = arith.constant dense<0.000000e+00> : vector<16x128xf32>
    %102 = tpu.matmul %101, %6, %cst_30 {dimension_numbers = #tpu.dot_dimension_numbers<[1], [0], [0], [1], [0, 0, 1, 1], [], []>} : vector<16x32xbf16>, vector<32x128xbf16>, vector<16x128xf32> -> vector<16x128xf32>
    %103 = vector.broadcast %20 : vector<1x128xf32> to vector<16x128xf32>
    %104 = arith.addf %102, %103 : vector<16x128xf32>
    %105 = arith.mulf %104, %104 : vector<16x128xf32>
    %106 = arith.mulf %104, %105 : vector<16x128xf32>
    %cst_31 = arith.constant 4.471500e-02 : f32
    %107 = vector.broadcast %cst_31 : f32 to vector<16x128xf32>
    %108 = arith.mulf %107, %106 : vector<16x128xf32>
    %109 = arith.addf %104, %108 : vector<16x128xf32>
    %cst_32 = arith.constant 0.797884583 : f32
    %110 = vector.broadcast %cst_32 : f32 to vector<16x128xf32>
    %111 = arith.mulf %110, %109 : vector<16x128xf32>
    %112 = math.tanh %111 : vector<16x128xf32>
    %cst_33 = arith.constant 1.000000e+00 : f32
    %113 = vector.broadcast %cst_33 : f32 to vector<16x128xf32>
    %114 = arith.addf %113, %112 : vector<16x128xf32>
    %cst_34 = arith.constant 5.000000e-01 : f32
    %115 = vector.broadcast %cst_34 : f32 to vector<16x128xf32>
    %116 = arith.mulf %115, %114 : vector<16x128xf32>
    %117 = arith.mulf %104, %116 : vector<16x128xf32>
    %118 = arith.truncf %117 : vector<16x128xf32> to vector<16x128xbf16>
    %cst_35 = arith.constant dense<0.000000e+00> : vector<16x32xf32>
    %119 = tpu.matmul %118, %7, %cst_35 {dimension_numbers = #tpu.dot_dimension_numbers<[1], [0], [0], [1], [0, 0, 1, 1], [], []>} : vector<16x128xbf16>, vector<128x32xbf16>, vector<16x32xf32> -> vector<16x32xf32>
    %120 = vector.broadcast %21 : vector<1x32xf32> to vector<16x32xf32>
    %121 = arith.addf %119, %120 : vector<16x32xf32>
    %122 = arith.addf %100, %121 : vector<16x32xf32>
    %cst_36 = arith.constant dense<0.000000e+00> : vector<16xf32>
    %123 = vector.multi_reduction <add>, %122, %cst_36 [1] : vector<16x32xf32> to vector<16xf32>
    %124 = vector.shape_cast %123 : vector<16xf32> to vector<16x1xf32>
    %cst_37 = arith.constant 3.200000e+01 : f32
    %125 = vector.broadcast %cst_37 : f32 to vector<16x1xf32>
    %126 = arith.divf %124, %125 : vector<16x1xf32>
    %127 = vector.broadcast %126 : vector<16x1xf32> to vector<16x32xf32>
    %128 = arith.subf %122, %127 : vector<16x32xf32>
    %129 = arith.mulf %128, %128 : vector<16x32xf32>
    %cst_38 = arith.constant dense<0.000000e+00> : vector<16xf32>
    %130 = vector.multi_reduction <add>, %129, %cst_38 [1] : vector<16x32xf32> to vector<16xf32>
    %131 = vector.shape_cast %130 : vector<16xf32> to vector<16x1xf32>
    %cst_39 = arith.constant 3.200000e+01 : f32
    %132 = vector.broadcast %cst_39 : f32 to vector<16x1xf32>
    %133 = arith.divf %131, %132 : vector<16x1xf32>
    %134 = vector.broadcast %126 : vector<16x1xf32> to vector<16x32xf32>
    %135 = arith.subf %122, %134 : vector<16x32xf32>
    %cst_40 = arith.constant 9.99999996E-13 : f32
    %136 = vector.broadcast %cst_40 : f32 to vector<16x1xf32>
    %137 = arith.addf %133, %136 : vector<16x1xf32>
    %138 = math.rsqrt %137 : vector<16x1xf32>
    %139 = vector.broadcast %138 : vector<16x1xf32> to vector<16x32xf32>
    %140 = arith.mulf %135, %139 : vector<16x32xf32>
    %141 = vector.broadcast %16 : vector<1x32xf32> to vector<16x32xf32>
    %142 = arith.mulf %140, %141 : vector<16x32xf32>
    %143 = vector.broadcast %17 : vector<1x32xf32> to vector<16x32xf32>
    %144 = arith.addf %142, %143 : vector<16x32xf32>
    %145 = arith.truncf %144 : vector<16x32xf32> to vector<16x32xbf16>
    %cst_41 = arith.constant dense<0.000000e+00> : vector<16x16xf32>
    %146 = tpu.matmul %145, %9, %cst_41 {dimension_numbers = #tpu.dot_dimension_numbers<[1], [0], [0], [1], [0, 0, 1, 1], [], []>} : vector<16x32xbf16>, vector<32x16xbf16>, vector<16x16xf32> -> vector<16x16xf32>
    %147 = vector.broadcast %22 : vector<1x16xf32> to vector<16x16xf32>
    %148 = arith.addf %146, %147 : vector<16x16xf32>
    %cst_42 = arith.constant dense<0.000000e+00> : vector<16x256xf32>
    %149 = tpu.matmul %145, %5, %cst_42 {dimension_numbers = #tpu.dot_dimension_numbers<[1], [0], [0], [1], [0, 0, 1, 1], [], []>} : vector<16x32xbf16>, vector<32x256xbf16>, vector<16x256xf32> -> vector<16x256xf32>
    %150 = vector.broadcast %23 : vector<1x256xf32> to vector<16x256xf32>
    %151 = arith.addf %149, %150 : vector<16x256xf32>
    %152 = vector.extract_strided_slice %151 {offsets = [0, 0], sizes = [16, 32], strides = [1, 1]} : vector<16x256xf32> to vector<16x32xf32>
    %cst_43 = arith.constant 0.000000e+00 : f32
    %153 = vector.broadcast %cst_43 : f32 to vector<16x32xf32>
    %154 = arith.maximumf %152, %153 : vector<16x32xf32>
    %155 = arith.truncf %154 : vector<16x32xf32> to vector<16x32xbf16>
    %cst_44 = arith.constant dense<0.000000e+00> : vector<16x16xf32>
    %156 = tpu.matmul %155, %10, %cst_44 {dimension_numbers = #tpu.dot_dimension_numbers<[1], [0], [0], [1], [0, 0, 1, 1], [], []>} : vector<16x32xbf16>, vector<32x16xbf16>, vector<16x16xf32> -> vector<16x16xf32>
    %157 = vector.broadcast %24 : vector<1x16xf32> to vector<16x16xf32>
    %158 = arith.addf %156, %157 : vector<16x16xf32>
    %159 = arith.negf %158 : vector<16x16xf32>
    %160 = math.exp %159 : vector<16x16xf32>
    %cst_45 = arith.constant 1.000000e+00 : f32
    %161 = vector.broadcast %cst_45 : f32 to vector<16x16xf32>
    %162 = arith.addf %161, %160 : vector<16x16xf32>
    %163 = arith.divf %161, %162 : vector<16x16xf32>
    %164 = vector.extract_strided_slice %151 {offsets = [0, 128], sizes = [16, 48], strides = [1, 1]} : vector<16x256xf32> to vector<16x48xf32>
    %cst_46 = arith.constant 0.000000e+00 : f32
    %165 = vector.broadcast %cst_46 : f32 to vector<16x48xf32>
    %166 = arith.maximumf %164, %165 : vector<16x48xf32>
    %167 = arith.truncf %166 : vector<16x48xf32> to vector<16x48xbf16>
    %cst_47 = arith.constant dense<0.000000e+00> : vector<16x16xf32>
    %168 = tpu.matmul %167, %11, %cst_47 {dimension_numbers = #tpu.dot_dimension_numbers<[1], [0], [0], [1], [0, 0, 1, 1], [], []>} : vector<16x48xbf16>, vector<48x16xbf16>, vector<16x16xf32> -> vector<16x16xf32>
    %169 = vector.broadcast %25 : vector<1x16xf32> to vector<16x16xf32>
    %170 = arith.addf %168, %169 : vector<16x16xf32>
    %171 = arith.negf %170 : vector<16x16xf32>
    %172 = math.exp %171 : vector<16x16xf32>
    %cst_48 = arith.constant 1.000000e+00 : f32
    %173 = vector.broadcast %cst_48 : f32 to vector<16x16xf32>
    %174 = arith.addf %173, %172 : vector<16x16xf32>
    %175 = arith.divf %173, %174 : vector<16x16xf32>
    %176 = tpu.concatenate %163, %175 in 0 : vector<16x16xf32>, vector<16x16xf32> -> vector<32x16xf32>
    %177 = arith.truncf %176 : vector<32x16xf32> to vector<32x16xbf16>
    %cst_49 = arith.constant dense<0.000000e+00> : vector<32x384xf32>
    %178 = tpu.matmul %177, %4, %cst_49 {dimension_numbers = #tpu.dot_dimension_numbers<[1], [0], [0], [1], [0, 0, 1, 1], [], []>} : vector<32x16xbf16>, vector<16x384xbf16>, vector<32x384xf32> -> vector<32x384xf32>
    %179 = vector.broadcast %26 : vector<1x384xf32> to vector<32x384xf32>
    %180 = arith.addf %178, %179 : vector<32x384xf32>
    %181 = arith.truncf %180 : vector<32x384xf32> to vector<32x384xbf16>
    %182 = vector.extract_strided_slice %181 {offsets = [0, 0], sizes = [32, 128], strides = [1, 1]} : vector<32x384xbf16> to vector<32x128xbf16>
    %183 = vector.extract_strided_slice %181 {offsets = [0, 128], sizes = [32, 128], strides = [1, 1]} : vector<32x384xbf16> to vector<32x128xbf16>
    %184 = vector.extract_strided_slice %181 {offsets = [0, 256], sizes = [32, 128], strides = [1, 1]} : vector<32x384xbf16> to vector<32x128xbf16>
    %cst_50 = arith.constant dense<0.000000e+00> : vector<32x32xf32>
    %185 = tpu.matmul %182, %183, %cst_50 {dimension_numbers = #tpu.dot_dimension_numbers<[1], [1], [0], [0], [0, 0, 1, 0], [], []>} : vector<32x128xbf16>, vector<32x128xbf16>, vector<32x32xf32> -> vector<32x32xf32>
    %186 = arith.addf %185, %28 : vector<32x32xf32>
    %cst_51 = arith.constant dense<0xFF800000> : vector<32xf32>
    %187 = vector.multi_reduction <maximumf>, %186, %cst_51 [1] : vector<32x32xf32> to vector<32xf32>
    %188 = vector.shape_cast %187 : vector<32xf32> to vector<32x1xf32>
    %189 = vector.broadcast %188 : vector<32x1xf32> to vector<32x32xf32>
    %190 = arith.subf %186, %189 : vector<32x32xf32>
    %191 = math.exp %190 : vector<32x32xf32>
    %cst_52 = arith.constant dense<0.000000e+00> : vector<32xf32>
    %192 = vector.multi_reduction <add>, %191, %cst_52 [1] : vector<32x32xf32> to vector<32xf32>
    %193 = vector.shape_cast %192 : vector<32xf32> to vector<32x1xf32>
    %194 = tpu.reciprocal %193 {approx = true} : vector<32x1xf32> -> vector<32x1xf32>
    %195 = vector.broadcast %194 : vector<32x1xf32> to vector<32x32xf32>
    %196 = arith.mulf %191, %195 : vector<32x32xf32>
    %197 = arith.truncf %196 : vector<32x32xf32> to vector<32x32xbf16>
    %cst_53 = arith.constant dense<0.000000e+00> : vector<32x128xf32>
    %198 = tpu.matmul %197, %184, %cst_53 {dimension_numbers = #tpu.dot_dimension_numbers<[1], [0], [0], [1], [0, 0, 1, 1], [], []>} : vector<32x32xbf16>, vector<32x128xbf16>, vector<32x128xf32> -> vector<32x128xf32>
    %199 = vector.extract_strided_slice %198 {offsets = [0, 0], sizes = [16, 16], strides = [1, 1]} : vector<32x128xf32> to vector<16x16xf32>
    %200 = vector.extract_strided_slice %198 {offsets = [16, 0], sizes = [16, 16], strides = [1, 1]} : vector<32x128xf32> to vector<16x16xf32>
    %201 = arith.addf %199, %200 : vector<16x16xf32>
    %cst_54 = arith.constant 3.000000e-01 : f32
    %202 = vector.broadcast %cst_54 : f32 to vector<16x16xf32>
    %203 = arith.mulf %202, %201 : vector<16x16xf32>
    %204 = arith.addf %203, %148 : vector<16x16xf32>
    %c0_55 = arith.constant 0 : index
    %c0_56 = arith.constant 0 : index
    %205 = vector.load %arg5[%c0_55, %c0_56] : memref<16x16xf32, #tpu.memory_space<vmem>>, vector<16x16xf32>
    tpu.vector_store %arg5[%c0_55, %c0_56], %204 {strides = array<i32>} : memref<16x16xf32, #tpu.memory_space<vmem>>, vector<16x16xf32>,
    return
  }
  func.func @transform_0(%arg0: i32) -> (i32, i32) {
    %c0_i32 = arith.constant 0 : i32
    %c0_i32_0 = arith.constant 0 : i32
    %c0_i32_1 = arith.constant 0 : i32
    return %c0_i32, %c0_i32_0 : i32, i32
  }
  func.func @transform_1(%arg0: i32) -> (i32, i32) {
    %c0_i32 = arith.constant 0 : i32
    %c0_i32_0 = arith.constant 0 : i32
    %c0_i32_1 = arith.constant 0 : i32
    return %c0_i32, %c0_i32_0 : i32, i32
  }
  func.func @transform_2(%arg0: i32) -> (i32, i32) {
    %c0_i32 = arith.constant 0 : i32
    %c0_i32_0 = arith.constant 0 : i32
    %c0_i32_1 = arith.constant 0 : i32
    return %c0_i32, %c0_i32_0 : i32, i32
  }
  func.func @transform_3(%arg0: i32) -> (i32, i32) {
    %c0_i32 = arith.constant 0 : i32
    %c0_i32_0 = arith.constant 0 : i32
    %c0_i32_1 = arith.constant 0 : i32
    return %c0_i32, %c0_i32_0 : i32, i32
  }
  func.func @transform_4(%arg0: i32) -> (i32, i32) {
    %c0_i32 = arith.constant 0 : i32
    %c0_i32_0 = arith.constant 0 : i32
    %c0_i32_1 = arith.constant 0 : i32
    return %c0_i32, %c0_i32_0 : i32, i32
  }
}

</mosaic_0001>

<bundles_post_ra>
// kernel: tpu_custom_call.1
= control target key start
LH: loop header
LB: loop body
LE: loop exit
PB: predicated region body
PF: predicated region fallthrough
CT: control target
= control target key end

     0   :  { %9 = vsyncpa [#allocation3], 0  ;;  %s1928_s0 = inlined_call_operand.vmem [shape: f32[16,32], index: 0, kind: input, shape index: {}]   ;;  %s1929_s1 = inlined_call_operand.vmem [shape: f32[48,32], index: 1, kind: input, shape index: {}]   ;;  %s1930_s2 = inlined_call_operand.hbm [shape: bf16[384,384], index: 2, kind: input, shape index: {}]   ;;  %s1931_s3 = inlined_call_operand.vmem [shape: f32[16,384], index: 3, kind: input, shape index: {}]   ;;  %s1932_s4 = inlined_call_operand.hbm [shape: f32[16,16], index: 4, kind: output, shape index: {}]  }
   0x1   :  { %10 = vsyncpa [#allocation4], 0  ;;  %s1655_s15 = smov [#allocation2]   ;;  %s1607_s19 = scalar_lea.hbm %s1930_s2, 9216 }
   0x2   :  { %s20_s16 = sshll.u32 %s1655_s15, 4  ;;  %p1608_p0 = scmp.ne.s32.totalorder %s1930_s2, %s1607_s19  ;;  %s21_s16 = int_to_ptr.vmem [resolvable:$true] %s20_s16 }
   0x3   :  { %p1611_p1 = scmp.lt.u32.totalorder %s1607_s19, %s1930_s2 }
   0x5   :  { %p1613_p2 = pnand %p1611_p1, %p1608_p0 }
   0x7   :  { %1616 = shalt.err (!%p1613_p2)
}
   0x8   :  { %s1617_s24 = scalar_lea.vmem %s21_s16, 9216  ;;  %p1622_p4 = scmp.lt.s32.totalorder %s21_s16, %s21_s16 }
   0x9   :  { %p1618_p3 = scmp.ne.s32.totalorder %s21_s16, %s1617_s24  ;;  %p1623_p5 = scmp.lt.s32.totalorder %s1617_s24, %s1617_s24 }
   0xb   :  { %p1624_p6 = por %p1623_p5, %p1622_p4 }
   0xd   :  { %p1625_p7 = pnand %p1624_p6, %p1618_p3 }
   0xf   :  { %1628 = shalt.err (!%p1625_p7)
}
  0x10   :  { %s1656_s25 = smov 192   ;;  %s1657_s26 = smov 12  }
  0x11   :  { %26 = dma.hbm_to_vmem [thread:$0]  %s1930_s2, 9216, %s21_s16, [#allocation3], %s1656_s25, %s1656_s25, %s1657_s26  }
  0x12   :  { %1651 = dma.done.wait [#allocation3], 9216  }
  0x13   :  { %1652 = vsyncadd [#allocation3], 4294958080  ;;  %vm101_vm0 = vcmask 261120   ;;  %v33_v0 = vld [vmem:[%s1928_s0] sm:$0xff]  ;;  %v34_v1 = vld [vmem:[%s1928_s0 + $0x8] sm:$0xff]  ;;  %v1658_v17 = vmov 0.0   ;;  %v129_v26 = vlaneseq }
  0x14   :  { %v102_v2 = vsel %vm101_vm0, %v33_v0, 0.0  ;;  %v105_v3 = vsel %vm101_vm0, %v34_v1, 0.0  ;;  %v1514_v14 = vld [vmem:[#allocation2 + $0x4] ss:$12 sps:$4 sm:$0xff]   ;;  %v1516_v15 = vld [vmem:[#allocation2] ss:$12 sps:$4 sm:$0xff]   ;;  %1401 = vmatprep.subr.bf16.mxu1 %v1658_v17 }
  0x15   :  { %103 = vadd.xlane.f32.xlu0 %v102_v2  ;;  %v1517_v16 = vld [vmem:[#allocation2 + $0x8] ss:$12 sps:$4 sm:$0xff]   ;;  %189 = vmatprep.subr.bf16.mxu0 %v1514_v14  ;;  %v1520_v19 = vld [vmem:[#allocation2 + $0x18] ss:$12 sps:$4 sm:$0xff]   ;;  %v1521_v20 = vld [vmem:[#allocation2 + $0x20] ss:$12 sps:$4 sm:$0xff]  }
  0x16   :  { %v1518_v18 = vld [vmem:[#allocation2 + $0x1c] ss:$12 sps:$4 sm:$0xff]   ;;  %190 = vmatpush1.bf16.msra.mxu0 %v1516_v15  ;;  %1402 = vmatpush3.bf16.msra.mxu1 %v1517_v16  ;;  %v1659_v21 = vmov 0   ;;  %vm1660_vm1 = vmmov 0   ;;  %v1718_v29 = vshrl.u32 %v129_v26, 7  ;;  %v1724_v31 = vld [vmem:[%s1931_s3] sm:$0xff] }
  0x17   :  { %191 = vmatprep.subr.bf16.mxu0 %v1518_v18  ;;  %1403 = vmatprep.subr.bf16.mxu1 %v1658_v17  ;;  %v37_v45 = vld [vmem:[%s1931_s3 + $0x10] sm:$0xff]  ;;  %v36_v46 = vld [vmem:[%s1931_s3 + $0x8] sm:$0xff]  ;;  %vm317_vm2 = vcmask 130048   ;;  %vm931_vm3 = vcmask 392192  }
  0x18   :  { %221 = vmatprep.mubr.bf16.mxu0 %v1659_v21  ;;  %1405 = vmatprep.mubr.msk.bf16.mxu1 %vm1660_vm1, %v1658_v17  ;;  %v131_v30 = vsub.s32 0, %v1718_v29  ;;  %v137_v35 = vsub.s32 1, %v1718_v29  ;;  %v1746_v44 = vsub.s32 6, %v1718_v29 }
  0x19   :  { %106 = vadd.xlane.f32.xlu0 %v105_v3  ;;  %v41_v3 = vld [vmem:[%s1929_s1] sm:$0xff] }
  0x1a   :  { %192 = vmatpush1.bf16.msra.mxu0 %v1520_v19  ;;  %1404 = vmatpush3.bf16.msra.mxu1 %v1521_v20  ;;  %v132_v34 = vrot.slane %v1724_v31, %v131_v30  ;;  %v138_v39 = vrot.slane %v1724_v31, %v137_v35  ;;  %v145_v47 = vrot.slane %v1724_v31, %v1746_v44 }
  0x1b   :  { %1415 = vmatprep.subr.bf16.mxu1 %v1658_v17  ;;  %1409 = vmatprep.subr.bf16.mxu0 %v1658_v17  ;;  %v153_v48 = vrot.slane %v37_v45, %v1746_v44  ;;  %v149_v51 = vrot.slane %v36_v46, %v1746_v44  ;;  %v388_v46 = vsub.s32 7, %v1718_v29 }
  0xa2   :  { %v104_v4 = vpop.xlane.xlu0 %103 }
  0xa3   :  { %v109_v5 = vmul.f32 0.03125, %v104_v4 }
  0xa5   :  { %v111_v6 = vsub.f32 %v33_v0, %v109_v5  ;;  %v42_v5 = vld [vmem:[%s1929_s1 + $0x8] sm:$0xff] }
  0xa6   :  { %v107_v7 = vpop.xlane.xlu0 %106 }
  0xa7   :  { %v110_v8 = vmul.f32 0.03125, %v107_v7  ;;  %v113_v9 = vmul.f32 %v111_v6, %v111_v6 }
  0xa9   :  { %v112_v10 = vsub.f32 %v34_v1, %v110_v8  ;;  %v115_v11 = vsel %vm101_vm0, %v113_v9, 0.0 }
  0xaa   :  { %116 = vadd.xlane.f32.xlu1 %v115_v11 }
  0xab   :  { %v114_v12 = vmul.f32 %v112_v10, %v112_v10 }
  0xad   :  { %v118_v13 = vsel %vm101_vm0, %v114_v12, 0.0 }
  0xae   :  { %119 = vadd.xlane.f32.xlu1 %v118_v13 }
 0x137   :  { %v117_v22 = vpop.xlane.xlu1 %116 }
 0x138   :  { %v121_v23 = vmul.f32 0.03125, %v117_v22 }
 0x13a   :  { %v123_v24 = vadd.f32 1e-12, %v121_v23 }
 0x13b   :  { %v120_v25 = vpop.xlane.xlu1 %119 }
 0x13c   :  { %1551 = vrsqrt.f32 %v123_v24  ;;  %v122_v27 = vmul.f32 0.03125, %v120_v25  ;;  %v1522_v25 = vld [vmem:[#allocation2 + $0x168] ss:$12 sps:$4 sm:$0xff]  }
 0x13e   :  { %v124_v28 = vadd.f32 1e-12, %v122_v27 }
 0x140   :  { %1553 = vrsqrt.f32 %v124_v28 }
 0x146   :  { %v1552_v32 = vpop.eup %1551 }
 0x147   :  { %v127_v33 = vmul.f32 %v1552_v32, %v111_v6 }
 0x149   :  { %v133_v38 = vmul.f32 %v132_v34, %v127_v33 }
 0x14a   :  { %v1554_v36 = vpop.eup %1553 }
 0x14b   :  { %v128_v37 = vmul.f32 %v1554_v36, %v112_v10  ;;  %v1733_v41 = vadd.f32 %v138_v39, %v133_v38 }
 0x14d   :  { %v134_v40 = vmul.f32 %v132_v34, %v128_v37  ;;  %v1523_v37 = vld [vmem:[#allocation2 + $0x180] ss:$12 sps:$4 sm:$0xff]  }
 0x14f   :  { %v1735_v42 = vadd.f32 %v138_v39, %v134_v40 }
 0x151   :  { %v141_v43 = vpack.c.bf16 %v1735_v42, %v1733_v41 }
 0x153   :  { %1313 = vmatmul.mubr.msk.bf16.vlgmr.msra.gmra.mrb[0].mxu0 %vm101_vm0, %v141_v43  ;;  %1406 = vmatmul.mubr.msk.bf16.vlgmr.msra.gmra.mrb[0].mxu1 %vm101_vm0, %v141_v43 }
 0x154   :  { %1411 = vmatprep.mubr.msk.bf16.mxu0 %vm1660_vm1, %v1658_v17  ;;  %1417 = vmatprep.mubr.msk.bf16.mxu1 %vm1660_vm1, %v1658_v17 }
 0x226   :  { %v223_v49 = vpop.f32.mrb[0].mxu0  ;;  %v266_v50 = vpop.f32.mrb[0].mxu1 }
 0x227   :  { %v225_v52 = vpop.f32.mrb[1].mxu0  ;;  %v1407_v53 = vpop.f32.mrb[1].mxu1  ;;  %v224_v56 = vadd.f32 %v223_v49, %v145_v47  ;;  %v267_v57 = vadd.f32 %v266_v50, %v153_v48 }
 0x228   :  { %v227_v54 = vpop.f32.mrb[2].mxu0  ;;  %v269_v55 = vpop.f32.mrb[2].mxu1  ;;  %v226_v62 = vadd.f32 %v225_v52, %v149_v51 }
 0x229   :  { %v228_v58 = vadd.f32 %v227_v54, %v145_v47  ;;  %v270_v59 = vadd.f32 %v269_v55, %v153_v48  ;;  %v229_v60 = vpop.f32.mrb[3].mxu0  ;;  %v1408_v61 = vpop.f32.mrb[3].mxu1  ;;  %v389_v47 = vrot.slane %v1724_v31, %v388_v46 }
 0x22a   :  { %v230_v63 = vadd.f32 %v229_v60, %v149_v51 }
 0x22b   :  { %v273_v0 = vpack.c.bf16 %v228_v58, %v224_v56  ;;  %v275_v1 = vpack.c.bf16 %v270_v59, %v267_v57 }
 0x22c   :  { %v274_v2 = vpack.c.bf16 %v230_v63, %v226_v62 }
 0x22d   :  { %1416 = vmatpush3.bf16.msra.mxu1 %v275_v1 }
 0x22e   :  { %1410 = vmatpush3.bf16.xpose.msra.mxu0 %v274_v2  ;;  %1429 = vmatprep.subr.bf16.mxu1 %v1658_v17 }
 0x22f   :  { %1421 = vmatprep.subr.bf16.mxu0 %v1658_v17 }
 0x235   :  { %1412 = vmatmul.mubr.bf16.vlgmr.msra.gmra.mrb[4].mxu0 %v273_v0 }
 0x236   :  { %1425 = vmatprep.mubr.msk.bf16.mxu0 %vm1660_vm1, %v1658_v17  ;;  %1422 = vmatpush3.bf16.msra.mxu0 %v1522_v25  ;;  %v1526_v25 = vld [vmem:[#allocation2 + $0xa8] ss:$12 sps:$4 sm:$0xff]  }
 0x237   :  { %1423 = vmatprep.subr.bf16.mxu0 %v1658_v17 }
 0x23a   :  { %1424 = vmatpush3.bf16.msra.mxu0 %v1523_v37  ;;  %v1818_v37 = vld [vmem:[%s1931_s3 + $0x18] sm:$0xff] }
 0x23b   :  { %1437 = vmatprep.subr.bf16.mxu0 %v1658_v17 }
 0x308   :  { %v310_v4 = vpop.f32.mrb[4].mxu0 }
 0x309   :  { %v311_v6 = vadd.f32 %v310_v4, %v41_v3  ;;  %v1413_v7 = vpop.f32.mrb[5].mxu0  ;;  %v1524_v3 = vld [vmem:[#allocation2 + $0x78] ss:$12 sps:$4 sm:$0xff]  }
 0x30a   :  { %v313_v8 = vpop.f32.mrb[6].mxu0 }
 0x30b   :  { %v314_v9 = vadd.f32 %v313_v8, %v42_v5  ;;  %v1414_v10 = vpop.f32.mrb[7].mxu0  ;;  %v318_v11 = vsel %vm317_vm2, %v311_v6, -inf }
 0x30c   :  { %319 = vmax.xlane.f32.xlu0 %v318_v11  ;;  %v476_v10 = vsub.s32 2, %v1718_v29 }
 0x30d   :  { %v321_v12 = vsel %vm317_vm2, %v314_v9, -inf }
 0x30e   :  { %322 = vmax.xlane.f32.xlu1 %v321_v12  ;;  %v477_v11 = vrot.slane %v1724_v31, %v476_v10  ;;  %v1795_v12 = vsub.s32 3, %v1718_v29 }
 0x399   :  { %v320_v13 = vpop.xlane.xlu0 %319 }
 0x39a   :  { %v324_v14 = vsub.f32 %v311_v6, %v320_v13 }
 0x39b   :  { %v323_v15 = vpop.xlane.xlu1 %322 }
 0x39c   :  { %v326_v16 = vmul.f32 1.442695, %v324_v14  ;;  %v325_v18 = vsub.f32 %v314_v9, %v323_v15 }
 0x39e   :  { %1555 = vpow2.f32 %v326_v16  ;;  %v328_v19 = vmul.f32 1.442695, %v325_v18 }
 0x3a0   :  { %1557 = vpow2.f32 %v328_v19  ;;  %v483_v19 = vrot.slane %v1724_v31, %v1795_v12 }
 0x3a8   :  { %v1556_v20 = vpop.eup %1555 }
 0x3a9   :  { %v330_v22 = vsel %vm317_vm2, %v1556_v20, 0.0 }
 0x3aa   :  { %v1558_v23 = vpop.eup %1557  ;;  %331 = vadd.xlane.f32.xlu0 %v330_v22 }
 0x3ab   :  { %v333_v24 = vsel %vm317_vm2, %v1558_v23, 0.0 }
 0x3ac   :  { %334 = vadd.xlane.f32.xlu1 %v333_v24 }
 0x437   :  { %v332_v26 = vpop.xlane.xlu0 %331 }
 0x438   :  { %1559 = vrcp.f32 %v332_v26  ;;  %v1527_v26 = vld [vmem:[#allocation2 + $0xc0] ss:$12 sps:$4 sm:$0xff]  }
 0x439   :  { %v335_v27 = vpop.xlane.xlu1 %334 }
 0x43a   :  { %1561 = vrcp.f32 %v335_v27  ;;  %v1528_v27 = vld [vmem:[#allocation2 + $0xd8] ss:$12 sps:$4 sm:$0xff]  }
 0x442   :  { %v1560_v28 = vpop.eup %1559 }
 0x443   :  { %v338_v33 = vmul.f32 %v1560_v28, %v1556_v20  ;;  %v1529_v28 = vld [vmem:[#allocation2 + $0xf0] ss:$12 sps:$4 sm:$0xff]  }
 0x444   :  { %v1562_v32 = vpop.eup %1561 }
 0x445   :  { %v339_v34 = vmul.f32 %v1562_v32, %v1558_v23  ;;  %v1530_v32 = vld [vmem:[#allocation2 + $0x108] ss:$12 sps:$4 sm:$0xff]  }
 0x447   :  { %v340_v36 = vpack.c.bf16 %v339_v34, %v338_v33  ;;  %v1531_v33 = vld [vmem:[#allocation2 + $0x120] ss:$12 sps:$4 sm:$0xff]   ;;  %v1532_v34 = vld [vmem:[#allocation2 + $0x138] ss:$12 sps:$4 sm:$0xff]  }
 0x449   :  { %1418 = vmatmul.mubr.msk.bf16.vlgmr.msra.gmra.mrb[4].mxu1 %vm317_vm2, %v340_v36  ;;  %v1533_v36 = vld [vmem:[#allocation2 + $0x150] ss:$12 sps:$4 sm:$0xff]  }
 0x44a   :  { %1433 = vmatprep.mubr.msk.bf16.mxu1 %vm1660_vm1, %v1658_v17  ;;  %1430 = vmatpush3.bf16.msra.mxu1 %v1524_v3 }
 0x44b   :  { %1431 = vmatprep.subr.bf16.mxu1 %v1658_v17 }
 0x51c   :  { %v378_v38 = vpop.f32.mrb[4].mxu1 }
 0x51d   :  { %v1419_v39 = vpop.f32.mrb[5].mxu1 }
 0x51e   :  { %v381_v40 = vpop.f32.mrb[6].mxu1 }
 0x51f   :  { %v385_v43 = vpack.c.bf16 %v381_v40, %v378_v38  ;;  %v1420_v45 = vpop.f32.mrb[7].mxu1  ;;  %v490_v38 = vrot.slane %v1818_v37, %v131_v30 }
 0x521   :  { %1426 = vmatmul.mubr.msk.bf16.vlgmr.msra.gmra.mrb[8].mxu0 %vm101_vm0, %v385_v43 }
 0x522   :  { %1453 = vmatprep.mubr.msk.bf16.mxu0 %vm1660_vm1, %v1658_v17  ;;  %1438 = vmatpush3.bf16.msra.mxu0 %v1526_v25  ;;  %v1534_v25 = vld [vmem:[#allocation2 + $0x198] ss:$12 sps:$4 sm:$0xff]  }
 0x523   :  { %1439 = vmatprep.subr.bf16.mxu0 %v1658_v17 }
 0x526   :  { %1440 = vmatpush3.bf16.msra.mxu0 %v1527_v26  ;;  %v1538_v26 = vld [vmem:[#allocation2 + $0x4c] ss:$12 sps:$4 sm:$0xff]  }
 0x527   :  { %1441 = vmatprep.subr.bf16.mxu0 %v1658_v17 }
 0x52a   :  { %1442 = vmatpush3.bf16.msra.mxu0 %v1528_v27 }
 0x52b   :  { %1443 = vmatprep.subr.bf16.mxu0 %v1658_v17 }
 0x52e   :  { %1444 = vmatpush3.bf16.msra.mxu0 %v1529_v28 }
 0x52f   :  { %1445 = vmatprep.subr.bf16.mxu0 %v1658_v17 }
 0x532   :  { %1446 = vmatpush3.bf16.msra.mxu0 %v1530_v32 }
 0x533   :  { %1447 = vmatprep.subr.bf16.mxu0 %v1658_v17 }
 0x536   :  { %1448 = vmatpush3.bf16.msra.mxu0 %v1531_v33 }
 0x537   :  { %1449 = vmatprep.subr.bf16.mxu0 %v1658_v17 }
 0x53a   :  { %1450 = vmatpush3.bf16.msra.mxu0 %v1532_v34 }
 0x53b   :  { %1451 = vmatprep.subr.bf16.mxu0 %v1658_v17 }
 0x53e   :  { %1452 = vmatpush3.bf16.msra.mxu0 %v1533_v36 }
 0x5f4   :  { %v439_v48 = vpop.f32.mrb[8].mxu0 }
 0x5f5   :  { %v440_v49 = vadd.f32 %v439_v48, %v389_v47  ;;  %v1427_v50 = vpop.f32.mrb[9].mxu0 }
 0x5f6   :  { %v442_v51 = vpop.f32.mrb[10].mxu0 }
 0x5f7   :  { %v443_v52 = vadd.f32 %v442_v51, %v389_v47  ;;  %v1428_v53 = vpop.f32.mrb[11].mxu0  ;;  %v446_v54 = vadd.f32 %v440_v49, %v1733_v41 }
 0x5f9   :  { %v448_v55 = vsel %vm101_vm0, %v446_v54, 0.0  ;;  %v447_v56 = vadd.f32 %v443_v52, %v1735_v42  ;;  %v1525_v42 = vld [vmem:[#allocation2 + $0x90] ss:$12 sps:$4 sm:$0xff]  }
 0x5fa   :  { %449 = vadd.xlane.f32.xlu0 %v448_v55  ;;  %1432 = vmatpush3.bf16.msra.mxu1 %v1525_v42 }
 0x5fb   :  { %v451_v57 = vsel %vm101_vm0, %v447_v56, 0.0  ;;  %1457 = vmatprep.subr.bf16.mxu1 %v1658_v17 }
 0x5fc   :  { %452 = vadd.xlane.f32.xlu1 %v451_v57 }
 0x687   :  { %v450_v58 = vpop.xlane.xlu0 %449 }
 0x688   :  { %v454_v59 = vmul.f32 0.03125, %v450_v58 }
 0x689   :  { %v453_v60 = vpop.xlane.xlu1 %452 }
 0x68a   :  { %v456_v61 = vsub.f32 %v446_v54, %v454_v59  ;;  %v455_v62 = vmul.f32 0.03125, %v453_v60 }
 0x68c   :  { %v457_v63 = vsub.f32 %v447_v56, %v455_v62  ;;  %v458_v0 = vmul.f32 %v456_v61, %v456_v61 }
 0x68e   :  { %v460_v1 = vsel %vm101_vm0, %v458_v0, 0.0  ;;  %v459_v2 = vmul.f32 %v457_v63, %v457_v63 }
 0x68f   :  { %461 = vadd.xlane.f32.xlu0 %v460_v1 }
 0x690   :  { %v463_v41 = vsel %vm101_vm0, %v459_v2, 0.0  ;;  %v569_v2 = vrot.slane %v1818_v37, %v137_v35 }
 0x691   :  { %464 = vadd.xlane.f32.xlu1 %v463_v41 }
 0x71c   :  { %v462_v4 = vpop.xlane.xlu0 %461 }
 0x71d   :  { %v466_v5 = vmul.f32 0.03125, %v462_v4 }
 0x71e   :  { %v465_v6 = vpop.xlane.xlu1 %464 }
 0x71f   :  { %v468_v7 = vadd.f32 1e-12, %v466_v5  ;;  %v467_v8 = vmul.f32 0.03125, %v465_v6 }
 0x721   :  { %1563 = vrsqrt.f32 %v468_v7  ;;  %v469_v9 = vadd.f32 1e-12, %v467_v8 }
 0x723   :  { %1565 = vrsqrt.f32 %v469_v9 }
 0x72b   :  { %v1564_v13 = vpop.eup %1563 }
 0x72c   :  { %v472_v14 = vmul.f32 %v1564_v13, %v456_v61 }
 0x72d   :  { %v1566_v15 = vpop.eup %1565 }
 0x72e   :  { %v478_v16 = vmul.f32 %v477_v11, %v472_v14  ;;  %v473_v18 = vmul.f32 %v1566_v15, %v457_v63 }
 0x730   :  { %v479_v20 = vmul.f32 %v477_v11, %v473_v18  ;;  %v1799_v22 = vadd.f32 %v483_v19, %v478_v16 }
 0x732   :  { %v1801_v23 = vadd.f32 %v483_v19, %v479_v20 }
 0x734   :  { %v486_v24 = vpack.c.bf16 %v1801_v23, %v1799_v22 }
 0x736   :  { %1434 = vmatmul.mubr.msk.bf16.vlgmr.msra.gmra.mrb[8].mxu1 %vm101_vm0, %v486_v24 }
 0x737   :  { %1461 = vmatprep.mubr.msk.bf16.mxu1 %vm1660_vm1, %v1658_v17  ;;  %1458 = vmatpush3.bf16.msra.mxu1 %v1534_v25 }
 0x738   :  { %1459 = vmatprep.subr.bf16.mxu1 %v1658_v17 }
 0x809   :  { %v540_v39 = vpop.f32.mrb[8].mxu1 }
 0x80a   :  { %v541_v40 = vadd.f32 %v540_v39, %v490_v38  ;;  %v1435_v43 = vpop.f32.mrb[9].mxu1 }
 0x80b   :  { %v543_v45 = vpop.f32.mrb[10].mxu1 }
 0x80c   :  { %v547_v46 = vmul.f32 %v541_v40, %v541_v40  ;;  %v544_v47 = vadd.f32 %v543_v45, %v490_v38  ;;  %v1436_v48 = vpop.f32.mrb[11].mxu1  ;;  %v689_v38 = vsub.s32 4, %v1718_v29 }
 0x80e   :  { %v549_v49 = vmul.f32 %v547_v46, %v541_v40  ;;  %v548_v50 = vmul.f32 %v544_v47, %v544_v47  ;;  %v690_v39 = vrot.slane %v1724_v31, %v689_v38 }
 0x810   :  { %v551_v51 = vmul.f32 0.044715, %v549_v49  ;;  %v550_v52 = vmul.f32 %v548_v50, %v544_v47 }
 0x812   :  { %v553_v53 = vadd.f32 %v551_v51, %v541_v40  ;;  %v552_v54 = vmul.f32 0.044715, %v550_v52 }
 0x814   :  { %v555_v55 = vmul.f32 0.7978846, %v553_v53  ;;  %v554_v56 = vadd.f32 %v552_v54, %v544_v47  ;;  %v1536_v53 = vld [vmem:[#allocation2 + $0x48] ss:$12 sps:$4 sm:$0xff]  }
 0x816   :  { %1567 = vtanh.f32 %v555_v55  ;;  %v556_v57 = vmul.f32 0.7978846, %v554_v56  ;;  %v1541_v55 = vld [vmem:[#allocation2 + $0x64] ss:$12 sps:$4 sm:$0xff]   ;;  %v1539_v56 = vld [vmem:[#allocation2 + $0x60] ss:$12 sps:$4 sm:$0xff]  }
 0x818   :  { %1569 = vtanh.f32 %v556_v57  ;;  %v1543_v57 = vld [vmem:[#allocation2 + $0x1e0] ss:$12 sps:$4 sm:$0xff]  }
 0x820   :  { %v1568_v58 = vpop.eup %1567 }
 0x821   :  { %v559_v30 = vadd.f32 1.0, %v1568_v58 }
 0x822   :  { %v1570_v59 = vpop.eup %1569 }
 0x823   :  { %v561_v60 = vmul.f32 0.5, %v559_v30  ;;  %v560_v61 = vadd.f32 1.0, %v1570_v59 }
 0x825   :  { %v562_v62 = vmul.f32 0.5, %v560_v61  ;;  %v563_v63 = vmul.f32 %v561_v60, %v541_v40  ;;  %v695_v40 = vsub.s32 5, %v1718_v29  ;;  %v1857_v61 = vld [vmem:[%s1931_s3 + $0x20] sm:$0xff] }
 0x827   :  { %v564_v0 = vmul.f32 %v562_v62, %v544_v47  ;;  %v696_v49 = vrot.slane %v1724_v31, %v695_v40  ;;  %v1542_v31 = vld [vmem:[#allocation2 + $0x1c8] ss:$12 sps:$4 sm:$0xff]   ;;  %v763_v62 = vrot.slane %v1818_v37, %v1795_v12 }
 0x829   :  { %v565_v1 = vpack.c.bf16 %v564_v0, %v563_v63  ;;  %v767_v63 = vrot.slane %v1857_v61, %v1795_v12  ;;  %v1546_v12 = vld [vmem:[#allocation2 + $0x228] ss:$12 sps:$4 sm:$0xff]  }
 0x82b   :  { %1454 = vmatmul.mubr.bf16.vlgmr.msra.gmra.mrb[12].mxu0 %v565_v1 }
 0x82c   :  { %1056 = vmatprep.mubr.bf16.mxu0 %v1659_v21 }
 0x8fe   :  { %v652_v41 = vpop.f32.mrb[12].mxu0 }
 0x8ff   :  { %v653_v3 = vadd.f32 %v652_v41, %v569_v2  ;;  %v1455_v42 = vpop.f32.mrb[13].mxu0 }
 0x900   :  { %v655_v4 = vpop.f32.mrb[14].mxu0 }
 0x901   :  { %v656_v5 = vadd.f32 %v655_v4, %v569_v2  ;;  %v1456_v6 = vpop.f32.mrb[15].mxu0  ;;  %v659_v7 = vadd.f32 %v653_v3, %v1799_v22 }
 0x903   :  { %v661_v8 = vsel %vm101_vm0, %v659_v7, 0.0  ;;  %v660_v9 = vadd.f32 %v656_v5, %v1801_v23  ;;  %v1535_v23 = vld [vmem:[#allocation2 + $0x1b0] ss:$12 sps:$4 sm:$0xff]  }
 0x904   :  { %662 = vadd.xlane.f32.xlu0 %v661_v8  ;;  %1460 = vmatpush3.bf16.msra.mxu1 %v1535_v23 }
 0x905   :  { %v664_v11 = vsel %vm101_vm0, %v660_v9, 0.0  ;;  %788 = vmatprep.subr.bf16.mxu1 %v1538_v26 }
 0x906   :  { %665 = vadd.xlane.f32.xlu1 %v664_v11  ;;  %v1544_v11 = vld [vmem:[#allocation2 + $0x1f8] ss:$12 sps:$4 sm:$0xff]  }
 0x991   :  { %v663_v13 = vpop.xlane.xlu0 %662 }
 0x992   :  { %v667_v14 = vmul.f32 0.03125, %v663_v13 }
 0x993   :  { %v666_v15 = vpop.xlane.xlu1 %665 }
 0x994   :  { %v669_v35 = vsub.f32 %v659_v7, %v667_v14  ;;  %v668_v16 = vmul.f32 0.03125, %v666_v15  ;;  %v1545_v15 = vld [vmem:[#allocation2 + $0x210] ss:$12 sps:$4 sm:$0xff]  }
 0x996   :  { %v670_v18 = vsub.f32 %v660_v9, %v668_v16  ;;  %v671_v19 = vmul.f32 %v669_v35, %v669_v35  ;;  %v1547_v16 = vld [vmem:[#allocation2 + $0x30] ss:$12 sps:$4 sm:$0xff]  }
 0x998   :  { %v673_v20 = vsel %vm101_vm0, %v671_v19, 0.0  ;;  %v672_v24 = vmul.f32 %v670_v18, %v670_v18  ;;  %v837_v19 = vrot.slane %v1818_v37, %v689_v38 }
 0x999   :  { %674 = vadd.xlane.f32.xlu0 %v673_v20 }
 0x99a   :  { %v676_v22 = vsel %vm101_vm0, %v672_v24, 0.0 }
 0x99b   :  { %677 = vadd.xlane.f32.xlu1 %v676_v22 }
 0xa26   :  { %v675_v27 = vpop.xlane.xlu0 %674 }
 0xa27   :  { %v679_v28 = vmul.f32 0.03125, %v675_v27 }
 0xa28   :  { %v678_v32 = vpop.xlane.xlu1 %677 }
 0xa29   :  { %v681_v33 = vadd.f32 1e-12, %v679_v28  ;;  %v680_v34 = vmul.f32 0.03125, %v678_v32  ;;  %v912_v28 = vrot.slane %v1818_v37, %v695_v40 }
 0xa2b   :  { %1571 = vrsqrt.f32 %v681_v33  ;;  %v682_v36 = vadd.f32 1e-12, %v680_v34 }
 0xa2d   :  { %1573 = vrsqrt.f32 %v682_v36 }
 0xa35   :  { %v1572_v43 = vpop.eup %1571 }
 0xa36   :  { %v685_v45 = vmul.f32 %v1572_v43, %v669_v35  ;;  %v1549_v35 = vld [vmem:[#allocation2 + $0x34] ss:$12 sps:$4 sm:$0xff]  }
 0xa37   :  { %v1574_v46 = vpop.eup %1573  ;;  %1024 = vmatprep.subr.bf16.mxu0 %v1549_v35 }
 0xa38   :  { %v691_v47 = vmul.f32 %v690_v39, %v685_v45  ;;  %v686_v48 = vmul.f32 %v1574_v46, %v670_v18  ;;  %1025 = vmatpush1.bf16.msra.mxu0 %v1547_v16  ;;  %v1550_v18 = vld [vmem:[#allocation2 + $0x38] ss:$12 sps:$4 sm:$0xff]  }
 0xa3a   :  { %v692_v50 = vmul.f32 %v690_v39, %v686_v48  ;;  %v697_v51 = vadd.f32 %v696_v49, %v691_v47 }
 0xa3c   :  { %v698_v52 = vadd.f32 %v696_v49, %v692_v50 }
 0xa3e   :  { %v699_v54 = vpack.c.bf16 %v698_v52, %v697_v51 }
 0xa40   :  { %1462 = vmatmul.mubr.msk.bf16.vlgmr.msra.gmra.mrb[12].mxu1 %vm101_vm0, %v699_v54 }
 0xa41   :  { %789 = vmatpush1.bf16.msra.mxu1 %v1536_v53  ;;  %820 = vmatprep.mubr.bf16.mxu1 %v1659_v21 }
 0xa42   :  { %790 = vmatprep.subr.bf16.mxu1 %v1541_v55 }
 0xa45   :  { %791 = vmatpush1.bf16.msra.mxu1 %v1539_v56 }
 0xa46   :  { %1465 = vmatprep.subr.bf16.mxu1 %v1658_v17 }
 0xa48   :  { %1337 = vmatmul.mubr.msk.bf16.vlgmr.msra.gmra.mrb[16].mxu1 %vm101_vm0, %v699_v54 }
 0xa49   :  { %1469 = vmatprep.mubr.msk.bf16.mxu1 %vm1660_vm1, %v1658_v17  ;;  %1466 = vmatpush3.bf16.msra.mxu1 %v1542_v31 }
 0xa4a   :  { %1467 = vmatprep.subr.bf16.mxu1 %v1658_v17 }
 0xa4d   :  { %1468 = vmatpush3.bf16.msra.mxu1 %v1543_v57 }
 0xa4e   :  { %1473 = vmatprep.subr.bf16.mxu1 %v1658_v17 }
 0xb13   :  { %v1850_v58 = vpop.f32.mrb[12].mxu1 }
 0xb14   :  { %v1463_v30 = vpop.f32.mrb[13].mxu1 }
 0xb15   :  { %v1852_v59 = vpop.f32.mrb[14].mxu1  ;;  %v997_v30 = vrot.slane %v1857_v61, %v1746_v44 }
 0xb16   :  { %v1464_v60 = vpop.f32.mrb[15].mxu1 }
 0xb17   :  { %v993_v60 = vrot.slane %v1818_v37, %v1746_v44 }
 0xb1b   :  { %v822_v0 = vpop.f32.mrb[16].mxu1 }
 0xb1c   :  { %v823_v1 = vadd.f32 %v822_v0, %v763_v62  ;;  %v824_v2 = vpop.f32.mrb[17].mxu1 }
 0xb1d   :  { %v825_v41 = vadd.f32 %v824_v2, %v767_v63  ;;  %v826_v3 = vpop.f32.mrb[18].mxu1 }
 0xb1e   :  { %v827_v42 = vadd.f32 %v826_v3, %v763_v62  ;;  %v828_v4 = vpop.f32.mrb[19].mxu1  ;;  %v831_v6 = vmax.f32 %v823_v1, 0.0 }
 0xb1f   :  { %v829_v5 = vadd.f32 %v828_v4, %v767_v63  ;;  %v906_v8 = vmax.f32 %v825_v41, 0.0 }
 0xb20   :  { %v832_v7 = vmax.f32 %v827_v42, 0.0 }
 0xb21   :  { %v907_v9 = vmax.f32 %v829_v5, 0.0  ;;  %v40_v5 = vld [vmem:[%s1931_s3 + $0x28] sm:$0xff] }
 0xb22   :  { %v833_v13 = vpack.c.bf16 %v832_v7, %v831_v6  ;;  %v1001_v61 = vrot.slane %v40_v5, %v1746_v44 }
 0xb23   :  { %v908_v14 = vpack.c.bf16 %v907_v9, %v906_v8 }
 0xb24   :  { %1470 = vmatmul.mubr.msk.bf16.vlgmr.msra.gmra.mrb[20].mxu1 %vm101_vm0, %v833_v13 }
 0xb25   :  { %1474 = vmatpush3.bf16.msra.mxu1 %v1544_v11  ;;  %1479 = vmatprep.mubr.msk.bf16.mxu1 %vm1660_vm1, %v1658_v17 }
 0xb26   :  { %1475 = vmatprep.subr.bf16.mxu1 %v1658_v17 }
 0xb29   :  { %1476 = vmatpush3.bf16.msra.mxu1 %v1545_v15 }
 0xb2a   :  { %1477 = vmatprep.subr.bf16.mxu1 %v1658_v17 }
 0xb2d   :  { %1478 = vmatpush3.bf16.msra.mxu1 %v1546_v12 }
 0xb2e   :  { %1483 = vmatprep.subr.bf16.mxu1 %v1550_v18 }
 0xb30   :  { %1480 = vmatmul.mubr.msk.bf16.vlgmr.msra.gmra.mrb[24].mxu1 %vm931_vm3, %v908_v14 }
 0xb31   :  { %1484 = vmatpush3.bf16.msra.mxu1 %v1550_v18 }
 0xbf7   :  { %v887_v20 = vpop.f32.mrb[20].mxu1 }
 0xbf8   :  { %v888_v24 = vadd.f32 %v887_v20, %v837_v19  ;;  %v1471_v22 = vpop.f32.mrb[21].mxu1 }
 0xbf9   :  { %v890_v25 = vpop.f32.mrb[22].mxu1 }
 0xbfa   :  { %v1341_v23 = vmul.f32 -1.442695, %v888_v24  ;;  %v891_v17 = vadd.f32 %v890_v25, %v837_v19  ;;  %v1472_v26 = vpop.f32.mrb[23].mxu1 }
 0xbfb   :  { %v43_v26 = vld [vmem:[%s1929_s1 + $0x10] sm:$0xff] }
 0xbfc   :  { %1575 = vpow2.f32 %v1341_v23  ;;  %v1342_v27 = vmul.f32 -1.442695, %v891_v17 }
 0xbfe   :  { %1577 = vpow2.f32 %v1342_v27 }
 0xc03   :  { %v969_v32 = vpop.f32.mrb[24].mxu1 }
 0xc04   :  { %v970_v33 = vadd.f32 %v969_v32, %v912_v28  ;;  %v1481_v34 = vpop.f32.mrb[25].mxu1 }
 0xc05   :  { %v972_v36 = vpop.f32.mrb[26].mxu1 }
 0xc06   :  { %v1576_v39 = vpop.eup %1575  ;;  %v1347_v38 = vmul.f32 -1.442695, %v970_v33  ;;  %v973_v43 = vadd.f32 %v972_v36, %v912_v28  ;;  %v1482_v45 = vpop.f32.mrb[27].mxu1  ;;  %v45_v28 = vld [vmem:[%s1929_s1 + $0x20] sm:$0xff]  ;;  %v44_v33 = vld [vmem:[%s1929_s1 + $0x18] sm:$0xff] }
 0xc07   :  { %v900_v46 = vadd.f32 1.0, %v1576_v39  ;;  %v46_v39 = vld [vmem:[%s1929_s1 + $0x28] sm:$0xff]  ;;  %s1661_s1 = smov [#allocation5]  }
 0xc08   :  { %v1578_v47 = vpop.eup %1577  ;;  %1579 = vpow2.f32 %v1347_v38  ;;  %v1348_v48 = vmul.f32 -1.442695, %v973_v43  ;;  %s1295_s28 = sshll.u32 %s1661_s1, 4  ;;  %s1296_s28 = int_to_ptr.vmem [resolvable:$true] %s1295_s28 }
 0xc09   :  { %1581 = vrcp.f32 %v900_v46  ;;  %v901_v49 = vadd.f32 1.0, %v1578_v47  ;;  %s1629_s29 = scalar_lea.vmem %s1296_s28, 256  ;;  %p1634_p9 = scmp.lt.s32.totalorder %s1296_s28, %s1296_s28 }
 0xc0a   :  { %1583 = vpow2.f32 %v1348_v48  ;;  %p1630_p8 = scmp.ne.s32.totalorder %s1296_s28, %s1629_s29  ;;  %p1635_p10 = scmp.lt.s32.totalorder %s1629_s29, %s1629_s29 }
 0xc0b   :  { %1585 = vrcp.f32 %v901_v49 }
 0xc0c   :  { %p1636_p11 = por %p1635_p10, %p1634_p9 }
 0xc0e   :  { %p1637_p12 = pnand %p1636_p11, %p1630_p8 }
 0xc12   :  { %v1580_v50 = vpop.eup %1579 }
 0xc13   :  { %v1582_v51 = vpop.eup %1581  ;;  %v982_v52 = vadd.f32 1.0, %v1580_v50 }
 0xc14   :  { %v1584_v40 = vpop.eup %1583 }
 0xc15   :  { %v1586_v53 = vpop.eup %1585  ;;  %v983_v54 = vadd.f32 1.0, %v1584_v40  ;;  %1587 = vrcp.f32 %v982_v52 }
 0xc16   :  { %v988_v55 = vpack.c.bf16 %v1586_v53, %v1582_v51 }
 0xc17   :  { %1589 = vrcp.f32 %v983_v54 }
 0xc18   :  { %1352 = vmatmul.mubr.msk.bf16.vlgmr.msra.gmra.mrb[16].mxu0 %vm317_vm2, %v988_v55  ;;  %1485 = vmatprep.mubr.msk.bf16.mxu1 %vm317_vm2, %v988_v55 }
 0xc19   :  { %1066 = vmatprep.mubr.bf16.mxu0 %v1659_v21 }
 0xc1f   :  { %v1588_v56 = vpop.eup %1587 }
 0xc21   :  { %v1590_v31 = vpop.eup %1589 }
 0xc22   :  { %v989_v57 = vpack.c.bf16 %v1590_v31, %v1588_v56 }
 0xc24   :  { %1353 = vmatmul.mubr.msk.bf16.gmra.mrb[20].mxu0 %vm317_vm2, %v989_v57  ;;  %1486 = vmatmul.mubr.msk.bf16.vlgmr.msra.gmra.mrb[28].mxu1 %vm317_vm2, %v989_v57 }
 0xceb   :  { %v1058_v62 = vpop.f32.mrb[16].mxu0 }
 0xcec   :  { %v1060_v63 = vpop.f32.mrb[17].mxu0  ;;  %v1059_v2 = vadd.f32 %v1058_v62, %v993_v60 }
 0xced   :  { %v1061_v0 = vadd.f32 %v1060_v63, %v997_v30  ;;  %v1062_v1 = vpop.f32.mrb[18].mxu0 }
 0xcee   :  { %v1063_v41 = vadd.f32 %v1062_v1, %v993_v60  ;;  %v1064_v21 = vpop.f32.mrb[19].mxu0 }
 0xcef   :  { %v1065_v3 = vadd.f32 %v1064_v21, %v997_v30 }
 0xcf0   :  { %v1126_v42 = vpack.c.bf16 %v1063_v41, %v1059_v2 }
 0xcf1   :  { %v1127_v4 = vpack.c.bf16 %v1065_v3, %v1061_v0 }
 0xcf2   :  { %1493 = vmatprep.mubr.bf16.mxu0 %v1126_v42 }
 0xcf3   :  { %1489 = vmatprep.subr.bf16.mxu0 %v1127_v4 }
 0xcf4   :  { %1490 = vmatpush3.bf16.xpose.msra.mxu0 %v1127_v4 }
 0xcf7   :  { %v1068_v6 = vpop.f32.mrb[20].mxu0  ;;  %v1487_v7 = vpop.f32.mrb[28].mxu1 }
 0xcf8   :  { %v1070_v8 = vpop.f32.mrb[21].mxu0  ;;  %v1111_v9 = vpop.f32.mrb[29].mxu1  ;;  %v1069_v15 = vadd.f32 %v1068_v6, %v993_v60  ;;  %v1120_v12 = vadd.f32 %v1487_v7, %v1001_v61 }
 0xcf9   :  { %v1071_v11 = vadd.f32 %v1070_v8, %v997_v30  ;;  %v1072_v13 = vpop.f32.mrb[22].mxu0  ;;  %v1488_v14 = vpop.f32.mrb[30].mxu1  ;;  %v1112_v20 = vadd.f32 %v1111_v9, %v1001_v61 }
 0xcfa   :  { %v1073_v35 = vadd.f32 %v1072_v13, %v993_v60  ;;  %v1123_v16 = vadd.f32 %v1488_v14, %v1001_v61  ;;  %v1074_v18 = vpop.f32.mrb[23].mxu0  ;;  %v1114_v19 = vpop.f32.mrb[31].mxu1 }
 0xcfb   :  { %v1075_v24 = vadd.f32 %v1074_v18, %v997_v30  ;;  %v1115_v22 = vadd.f32 %v1114_v19, %v1001_v61  ;;  %v703_v18 = vrot.slane %v1818_v37, %v476_v10 }
 0xcfc   :  { %v1129_v25 = vpack.c.bf16 %v1073_v35, %v1069_v15  ;;  %v1131_v23 = vpack.c.bf16 %v1123_v16, %v1120_v12 }
 0xcfd   :  { %v1130_v17 = vpack.c.bf16 %v1075_v24, %v1071_v11  ;;  %v1128_v44 = vpack.c.bf16 %v1115_v22, %v1112_v20 }
 0xcff   :  { %1491 = vmatprep.subr.bf16.mxu0 %v1130_v17  ;;  %1497 = vmatprep.subr.bf16.mxu1 %v1128_v44 }
 0xd00   :  { %1492 = vmatpush3.bf16.xpose.msra.mxu0 %v1130_v17  ;;  %1498 = vmatpush3.bf16.msra.mxu1 %v1128_v44 }
 0xd01   :  { %1499 = vmatprep.subr.bf16.mxu1 %v1131_v23 }
 0xd04   :  { %1500 = vmatpush3.bf16.msra.mxu1 %v1131_v23  ;;  %v754_v23 = vadd.f32 %v1850_v58, %v703_v18 }
 0xd07   :  { %1494 = vmatmul.mubr.bf16.vlgmr.msra.gmra.mrb[24].mxu0 %v1129_v25 }
 0xdda   :  { %v1495_v27 = vpop.f32.mrb[24].mxu0 }
 0xddb   :  { %v1166_v32 = vpop.f32.mrb[25].mxu0  ;;  %v1175_v43 = vadd.f32 %v1495_v27, %v45_v28 }
 0xddc   :  { %v1167_v34 = vadd.f32 %v1166_v32, %v43_v26  ;;  %v1496_v36 = vpop.f32.mrb[26].mxu0  ;;  %v757_v26 = vadd.f32 %v1852_v59, %v703_v18 }
 0xddd   :  { %v1169_v38 = vpop.f32.mrb[27].mxu0  ;;  %v1178_v47 = vadd.f32 %v1496_v36, %v46_v39  ;;  %v1187_v49 = vsel %vm101_vm0, %v1175_v43, -inf }
 0xdde   :  { %v1170_v45 = vadd.f32 %v1169_v38, %v44_v33  ;;  %v1181_v46 = vsel %vm101_vm0, %v1167_v34, -inf }
 0xddf   :  { %1182 = vmax.xlane.f32.xlu0 %v1181_v46  ;;  %v1190_v50 = vsel %vm101_vm0, %v1178_v47, -inf }
 0xde0   :  { %v1184_v48 = vsel %vm101_vm0, %v1170_v45, -inf }
 0xde1   :  { %1185 = vmax.xlane.f32.xlu1 %v1184_v48 }
 0xde3   :  { %1188 = vmax.xlane.f32.xlu0 %v1187_v49 }
 0xde5   :  { %1191 = vmax.xlane.f32.xlu1 %v1190_v50 }
 0xe6c   :  { %v1183_v51 = vpop.xlane.xlu0 %1182 }
 0xe6d   :  { %v1193_v52 = vsub.f32 %v1167_v34, %v1183_v51 }
 0xe6e   :  { %v1186_v40 = vpop.xlane.xlu1 %1185 }
 0xe6f   :  { %v1197_v53 = vmul.f32 1.442695, %v1193_v52  ;;  %v1194_v54 = vsub.f32 %v1170_v45, %v1186_v40 }
 0xe70   :  { %v1189_v55 = vpop.xlane.xlu0 %1188 }
 0xe71   :  { %1591 = vpow2.f32 %v1197_v53  ;;  %v1199_v56 = vmul.f32 1.442695, %v1194_v54  ;;  %v1195_v31 = vsub.f32 %v1175_v43, %v1189_v55 }
 0xe72   :  { %v1192_v57 = vpop.xlane.xlu1 %1191 }
 0xe73   :  { %1593 = vpow2.f32 %v1199_v56  ;;  %v1201_v30 = vmul.f32 1.442695, %v1195_v31  ;;  %v1196_v60 = vsub.f32 %v1178_v47, %v1192_v57 }
 0xe75   :  { %1595 = vpow2.f32 %v1201_v30  ;;  %v1203_v62 = vmul.f32 1.442695, %v1196_v60 }
 0xe77   :  { %1597 = vpow2.f32 %v1203_v62 }
 0xe7b   :  { %v1592_v63 = vpop.eup %1591 }
 0xe7c   :  { %v1205_v0 = vsel %vm101_vm0, %v1592_v63, 0.0 }
 0xe7d   :  { %v1594_v1 = vpop.eup %1593  ;;  %1206 = vadd.xlane.f32.xlu0 %v1205_v0 }
 0xe7e   :  { %v1208_v2 = vsel %vm101_vm0, %v1594_v1, 0.0 }
 0xe7f   :  { %v1596_v41 = vpop.eup %1595  ;;  %1209 = vadd.xlane.f32.xlu1 %v1208_v2 }
 0xe80   :  { %v1211_v21 = vsel %vm101_vm0, %v1596_v41, 0.0 }
 0xe81   :  { %v1598_v3 = vpop.eup %1597  ;;  %1212 = vadd.xlane.f32.xlu0 %v1211_v21 }
 0xe82   :  { %v1214_v42 = vsel %vm101_vm0, %v1598_v3, 0.0 }
 0xe83   :  { %1215 = vadd.xlane.f32.xlu1 %v1214_v42 }
 0xf0a   :  { %v1207_v4 = vpop.xlane.xlu0 %1206 }
 0xf0b   :  { %1599 = vrcp.f32 %v1207_v4 }
 0xf0c   :  { %v1210_v5 = vpop.xlane.xlu1 %1209 }
 0xf0d   :  { %1601 = vrcp.f32 %v1210_v5 }
 0xf0e   :  { %v1213_v61 = vpop.xlane.xlu0 %1212 }
 0xf0f   :  { %1603 = vrcp.f32 %v1213_v61 }
 0xf10   :  { %v1216_v6 = vpop.xlane.xlu1 %1215 }
 0xf11   :  { %1605 = vrcp.f32 %v1216_v6 }
 0xf15   :  { %v1600_v7 = vpop.eup %1599 }
 0xf16   :  { %v1221_v9 = vmul.f32 %v1600_v7, %v1592_v63 }
 0xf17   :  { %v1602_v8 = vpop.eup %1601 }
 0xf18   :  { %v1222_v11 = vmul.f32 %v1602_v8, %v1594_v1 }
 0xf19   :  { %v1604_v13 = vpop.eup %1603 }
 0xf1a   :  { %v1225_v14 = vpack.c.bf16 %v1222_v11, %v1221_v9  ;;  %v1223_v12 = vmul.f32 %v1604_v13, %v1596_v41 }
 0xf1b   :  { %v1606_v15 = vpop.eup %1605 }
 0xf1c   :  { %v1224_v35 = vmul.f32 %v1606_v15, %v1598_v3  ;;  %1501 = vmatprep.mubr.msk.bf16.mxu1 %vm101_vm0, %v1225_v14 }
 0xf1e   :  { %v1226_v16 = vpack.c.bf16 %v1224_v35, %v1223_v12 }
 0xf20   :  { %1502 = vmatmul.mubr.msk.bf16.vlgmr.msra.gmra.mrb[32].mxu1 %vm101_vm0, %v1226_v16 }
 0xff3   :  { %v1503_v19 = vpop.f32.mrb[32].mxu1 }
 0xff4   :  { %v1267_v20 = vpop.f32.mrb[33].mxu1 }
 0xff5   :  { %v1282_v24 = vadd.f32 %v1503_v19, %v1267_v20  ;;  %v1504_v22 = vpop.f32.mrb[34].mxu1 }
 0xff6   :  { %v1270_v25 = vpop.f32.mrb[35].mxu1 }
 0xff7   :  { %v1284_v17 = vmul.f32 0.3, %v1282_v24  ;;  %v1283_v44 = vadd.f32 %v1504_v22, %v1270_v25 }
 0xff9   :  { %v1286_v27 = vadd.f32 %v1284_v17, %v754_v23  ;;  %v1285_v28 = vmul.f32 0.3, %v1283_v44 }
 0xffb   :  { %1288 = vst.msk [vmem:[#allocation5] sm:$0xff] %vm317_vm2, %v1286_v27  ;;  %v1287_v29 = vadd.f32 %v1285_v28, %v757_v26 }
 0xffd   :  { %1289 = vst.msk [vmem:[#allocation5 + $0x8] sm:$0xff] %vm317_vm2, %v1287_v29 }
 0xffe   :  { %1640 = shalt.err (!%p1637_p12)
}
 0xfff   :  { %s1641_s6 = scalar_lea.hbm %s1932_s4, 256 }
0x1000   :  { %p1642_p13 = scmp.ne.s32.totalorder %s1932_s4, %s1641_s6  ;;  %p1645_p0 = scmp.lt.u32.totalorder %s1641_s6, %s1932_s4 }
0x1002   :  { %p1647_p1 = pnand %p1645_p0, %p1642_p13 }
0x1004   :  { %1650 = shalt.err (!%p1647_p1)
}
0x1005   :  { %s1662_s9 = smov 128   ;;  %s1663_s10 = smov 8  }
0x1006   :  { %1301 = dma.vmem_to_hbm [thread:$0]  %s1296_s28, 256, %s1932_s4, [#allocation4], %s1662_s9, %s1662_s9, %s1663_s10  }
0x1007   :  { %1653 = dma.done.wait [#allocation4], 256  }
0x1008   :  { %1654 = vsyncadd [#allocation4], 4294967040 }
0x1009   :  { %1305 = vsyncpa [#allocation3], 1 }
0x100a   :  { %1306 = vsyncpa [#allocation4], 1 }

</bundles_post_ra>
